<compile_context>
chip_gen: v7x
topology: tpu7x:2x2x1
jax: 0.10.0
libtpu: 0.0.40
codegen_flags: <defaults>
</compile_context>

<pallas_src>
import functools

import jax
import jax.numpy as jnp
from jax.experimental import pallas as pl
from jax.experimental.pallas import tpu as pltpu


def convnet_kernel(x_ref, w1_ref, b1_ref, w2_ref, b2_ref, w3_ref, b3_ref, o_ref):
    # Activations arrive in their producer dtype (f32); cast to the weight
    # compute dtype in-kernel (free VPU slack, avoids a wrapper read+write pass).
    x = x_ref[...].astype(w1_ref.dtype)

    # conv1: 1x1 conv over all P pixels as one matmul against a block-diagonal
    # weight whose rows follow the native NCHW flatten order (ci*P + p).
    h1 = jnp.dot(x, w1_ref[...], preferred_element_type=jnp.float32)
    h1 = jnp.maximum(h1 + b1_ref[...], 0.0)                      # (TB, P*Ch) f32

    # conv2: 3x3 valid conv on a 3x3 input == one matmul with K = P*Ch = 288.
    h1 = h1.astype(w2_ref.dtype)
    h2 = jnp.dot(h1, w2_ref[...], preferred_element_type=jnp.float32)
    h2 = jnp.maximum(h2 + b2_ref[...], 0.0)                      # (TB, Ch) f32

    # final Linear
    h2 = h2.astype(w3_ref.dtype)
    out = jnp.dot(h2, w3_ref[...], preferred_element_type=jnp.float32) + b3_ref[...]
    o_ref[...] = out.astype(o_ref.dtype)


def prepare_params(params, H=3, W=3, compute_dtype=jnp.bfloat16):
    """One-time weight layout plumbing (hoisted out of the per-call path).

    Returns:
      w1bd: (Cin*P, P*Ch) block-diagonal 1x1-conv weight, rows (ci, p) to match
            the native NCHW flatten, cols (p, co)
      b1t : (1, P*Ch)     conv1 bias tiled per pixel (f32)
      w2f : (P*Ch, Ch)    3x3 conv weight, rows (p, ci), cols co
      b2r : (1, Ch)       conv2 bias (f32)
      w3t : (Ch, Cout)    linear weight (transposed)
      b3r : (1, Cout)     linear bias (f32)
    """
    w1, b1, w2, b2, w3, b3 = params
    Ch, Cin = w1.shape[0], w1.shape[1]
    Cout = w3.shape[0]
    P = H * W

    w1t = w1.reshape(Ch, Cin).T                                    # (Cin, Ch)
    eye_p = jnp.eye(P, dtype=w1t.dtype)
    # w1bd[ci*P + p, q*Ch + co] = delta(p, q) * w1[co, ci]
    w1bd = jnp.einsum("pq,ic->ipqc", eye_p, w1t).reshape(Cin * P, P * Ch)
    b1t = jnp.tile(b1.reshape(1, Ch), (1, P)).astype(jnp.float32)  # (1, P*Ch)
    w2f = jnp.transpose(w2, (2, 3, 1, 0)).reshape(P * Ch, Ch)      # rows (p, ci)
    b2r = b2.reshape(1, Ch).astype(jnp.float32)
    w3t = w3.T                                                     # (Ch, Cout)
    b3r = b3.reshape(1, Cout).astype(jnp.float32)

    cdt = jnp.dtype(compute_dtype)
    return (w1bd.astype(cdt), b1t, w2f.astype(cdt), b2r, w3t.astype(cdt), b3r)


def _cdiv(a, b):
    return (a + b - 1) // b


def _round_up(n, m):
    return ((n + m - 1) // m) * m


@functools.partial(jax.jit, static_argnames=("batch_tile",))
def convnet_forward(x, prepped, *, batch_tile=2048):
    """x: (B, Cin, H, W) NCHW with H == W == 3. Returns (B, Cout) float32."""
    w1bd, b1t, w2f, b2r, w3t, b3r = prepped
    B, Cin, H, W = x.shape
    P = H * W
    PCin = P * Cin
    PCh, Ch = w2f.shape
    Cout = w3t.shape[1]

    assert w1bd.shape == (PCin, PCh), (w1bd.shape, PCin, PCh)
    assert batch_tile % 16 == 0, "batch_tile must be a multiple of 16"

    # Only per-call glue: the native NCHW flatten (contiguous, zero-cost).
    x_flat = x.reshape(B, PCin)

    # Batch tiling. No padding copy: grid = cdiv(B, TB); Pallas masks the
    # partial last block's writes (all ops are row-independent).
    if B <= 64:
        TB = B                                            # single full-array block
    elif B <= batch_tile:
        # >= 2 grid steps so both v7x TensorCores get work; TB multiple of 16.
        TB = min(batch_tile, _round_up(_cdiv(B, 2), 16))
    else:
        TB = batch_tile
    grid = (_cdiv(B, TB),)

    w_itemsize = jnp.dtype(w1bd.dtype).itemsize
    cost = pl.CostEstimate(
        flops=2 * B * (PCin * PCh + PCh * Ch + Ch * Cout),
        transcendentals=0,
        bytes_accessed=x_flat.size * x_flat.dtype.itemsize
        + (w1bd.size + w2f.size + w3t.size) * w_itemsize
        + (b1t.size + b2r.size + b3r.size + B * Cout) * 4,
    )

    out = pl.pallas_call(
        convnet_kernel,
        out_shape=jax.ShapeDtypeStruct((B, Cout), jnp.float32),
        grid=grid,
        in_specs=[
            pl.BlockSpec((TB, PCin), lambda i: (i, 0)),   # activations: batch-tiled
            pl.BlockSpec(w1bd.shape, lambda i: (0, 0)),   # weights/biases: resident
            pl.BlockSpec(b1t.shape, lambda i: (0, 0)),
            pl.BlockSpec(w2f.shape, lambda i: (0, 0)),
            pl.BlockSpec(b2r.shape, lambda i: (0, 0)),
            pl.BlockSpec(w3t.shape, lambda i: (0, 0)),
            pl.BlockSpec(b3r.shape, lambda i: (0, 0)),
        ],
        out_specs=pl.BlockSpec((TB, Cout), lambda i: (i, 0)),
        compiler_params=pltpu.CompilerParams(
            dimension_semantics=("parallel",),            # both TCs on v7x
            vmem_limit_bytes=48 * 1024 * 1024,            # headroom on v5e defaults
        ),
        cost_estimate=cost,
    )(x_flat, w1bd, b1t, w2f, b2r, w3t, b3r)

    return out


def ref_forward(x, params):
    """Pure-JAX reference mirroring the PyTorch forward."""
    w1, b1, w2, b2, w3, b3 = params
    dn = ("NCHW", "OIHW", "NCHW")
    h = jax.lax.conv_general_dilated(x, w1, (1, 1), "VALID", dimension_numbers=dn)
    h = jnp.maximum(h + b1[None, :, None, None], 0.0)
    h = jax.lax.conv_general_dilated(h, w2, (1, 1), "VALID", dimension_numbers=dn)
    h = jnp.maximum(h + b2[None, :, None, None], 0.0)
    h = h.reshape(-1, w3.shape[1])
    return h @ w3.T + b3[None, :]


def init_params(key, input_dim=11, hidden_dim=32, out_dim=128):
    ks = jax.random.split(key, 6)
    w1 = jax.random.normal(ks[0], (hidden_dim, input_dim, 1, 1), jnp.float32) * 0.1
    b1 = jax.random.normal(ks[1], (hidden_dim,), jnp.float32) * 0.1
    w2 = jax.random.normal(ks[2], (hidden_dim, hidden_dim, 3, 3), jnp.float32) * 0.1
    b2 = jax.random.normal(ks[3], (hidden_dim,), jnp.float32) * 0.1
    w3 = jax.random.normal(ks[4], (out_dim, hidden_dim), jnp.float32) * 0.1
    b3 = jax.random.normal(ks[5], (out_dim,), jnp.float32) * 0.1
    return (w1, b1, w2, b2, w3, b3)


if __name__ == "__main__":
    key = jax.random.PRNGKey(0)
    kx, kp, kx2 = jax.random.split(key, 3)

    # ConvNet defaults: input_dim=11, inp_size=3 (=> one ConvLayer), hidden=32, out=128
    B, Cin, H, W = 2, 11, 3, 3
    x = jax.random.normal(kx, (B, Cin, H, W), jnp.float32)
    params = init_params(kp)
    ref = ref_forward(x, params)

    # Strict f32-operand correctness check.
    prepped_f32 = prepare_params(params, H, W, compute_dtype=jnp.float32)
    out = jax.block_until_ready(convnet_forward(x, prepped_f32))
    assert out.shape == (B, 128), out.shape
    assert jnp.allclose(out, ref, atol=1e-4, rtol=1e-4), float(jnp.max(jnp.abs(out - ref)))

    # Default bf16-operand / f32-accumulation path (the MXU-friendly configuration).
    prepped_bf16 = prepare_params(params, H, W)
    out_bf16 = jax.block_until_ready(convnet_forward(x, prepped_bf16))
    assert jnp.allclose(out_bf16, ref, atol=5e-2, rtol=5e-2), float(
        jnp.max(jnp.abs(out_bf16 - ref)))

    # Exercise the multi-step grid + masked partial last block (no pad copy):
    # B=100 -> TB=64, grid=2, second block rows 100..127 masked on writeback.
    B2 = 100
    x2 = jax.random.normal(kx2, (B2, Cin, H, W), jnp.float32)
    out2 = jax.block_until_ready(convnet_forward(x2, prepped_f32))
    ref2 = ref_forward(x2, params)
    assert out2.shape == (B2, 128), out2.shape
    assert jnp.allclose(out2, ref2, atol=1e-4, rtol=1e-4), float(
        jnp.max(jnp.abs(out2 - ref2)))

    print("KERNEL_OK")
</pallas_src>

<mosaic_0001>
module attributes {stable_mosaic.version = 11 : i64} {
  func.func @convnet_kernel(%arg0: i32, %arg1: memref<2x99xf32, #tpu.memory_space<vmem>>, %arg2: memref<99x288xf32, #tpu.memory_space<vmem>>, %arg3: memref<1x288xf32, #tpu.memory_space<vmem>>, %arg4: memref<288x32xf32, #tpu.memory_space<vmem>>, %arg5: memref<1x32xf32, #tpu.memory_space<vmem>>, %arg6: memref<32x128xf32, #tpu.memory_space<vmem>>, %arg7: memref<1x128xf32, #tpu.memory_space<vmem>>, %arg8: memref<2x128xf32, #tpu.memory_space<vmem>>) attributes {dimension_semantics = [#tpu.dimension_semantics<parallel>], iteration_bounds = array<i64: 1>, scalar_prefetch = 0 : i64, scratch_operands = 0 : i64, tpu.core_type = #tpu.core_type<tc>, window_params = [{transform_indices = @transform_0, window_bounds = array<i64: 2, 99>}, {pipeline_mode = #tpu.pipeline_mode<synchronous>, transform_indices = @transform_1, window_bounds = array<i64: 99, 288>}, {pipeline_mode = #tpu.pipeline_mode<synchronous>, transform_indices = @transform_2, window_bounds = array<i64: 1, 288>}, {pipeline_mode = #tpu.pipeline_mode<synchronous>, transform_indices = @transform_3, window_bounds = array<i64: 288, 32>}, {pipeline_mode = #tpu.pipeline_mode<synchronous>, transform_indices = @transform_4, window_bounds = array<i64: 1, 32>}, {pipeline_mode = #tpu.pipeline_mode<synchronous>, transform_indices = @transform_5, window_bounds = array<i64: 32, 128>}, {pipeline_mode = #tpu.pipeline_mode<synchronous>, transform_indices = @transform_6, window_bounds = array<i64: 1, 128>}, {transform_indices = @transform_7, window_bounds = array<i64: 2, 128>}]} {
    %c0 = arith.constant 0 : index
    %c0_0 = arith.constant 0 : index
    %0 = vector.load %arg1[%c0, %c0_0] : memref<2x99xf32, #tpu.memory_space<vmem>>, vector<2x99xf32>
    %c0_1 = arith.constant 0 : index
    %c0_2 = arith.constant 0 : index
    %1 = vector.load %arg2[%c0_1, %c0_2] : memref<99x288xf32, #tpu.memory_space<vmem>>, vector<99x288xf32>
    %cst = arith.constant dense<0.000000e+00> : vector<2x288xf32>
    %2 = tpu.matmul %0, %1, %cst {dimension_numbers = #tpu.dot_dimension_numbers<[1], [0], [0], [1], [0, 0, 1, 1], [], []>} : vector<2x99xf32>, vector<99x288xf32>, vector<2x288xf32> -> vector<2x288xf32>
    %c0_3 = arith.constant 0 : index
    %c0_4 = arith.constant 0 : index
    %3 = vector.load %arg3[%c0_3, %c0_4] : memref<1x288xf32, #tpu.memory_space<vmem>>, vector<1x288xf32>
    %4 = vector.broadcast %3 : vector<1x288xf32> to vector<2x288xf32>
    %5 = arith.addf %2, %4 : vector<2x288xf32>
    %cst_5 = arith.constant 0.000000e+00 : f32
    %6 = vector.broadcast %cst_5 : f32 to vector<2x288xf32>
    %7 = arith.maximumf %5, %6 : vector<2x288xf32>
    %c0_6 = arith.constant 0 : index
    %c0_7 = arith.constant 0 : index
    %8 = vector.load %arg4[%c0_6, %c0_7] : memref<288x32xf32, #tpu.memory_space<vmem>>, vector<288x32xf32>
    %cst_8 = arith.constant dense<0.000000e+00> : vector<2x32xf32>
    %9 = tpu.matmul %7, %8, %cst_8 {dimension_numbers = #tpu.dot_dimension_numbers<[1], [0], [0], [1], [0, 0, 1, 1], [], []>} : vector<2x288xf32>, vector<288x32xf32>, vector<2x32xf32> -> vector<2x32xf32>
    %c0_9 = arith.constant 0 : index
    %c0_10 = arith.constant 0 : index
    %10 = vector.load %arg5[%c0_9, %c0_10] : memref<1x32xf32, #tpu.memory_space<vmem>>, vector<1x32xf32>
    %11 = vector.broadcast %10 : vector<1x32xf32> to vector<2x32xf32>
    %12 = arith.addf %9, %11 : vector<2x32xf32>
    %cst_11 = arith.constant 0.000000e+00 : f32
    %13 = vector.broadcast %cst_11 : f32 to vector<2x32xf32>
    %14 = arith.maximumf %12, %13 : vector<2x32xf32>
    %c0_12 = arith.constant 0 : index
    %c0_13 = arith.constant 0 : index
    %15 = vector.load %arg6[%c0_12, %c0_13] : memref<32x128xf32, #tpu.memory_space<vmem>>, vector<32x128xf32>
    %cst_14 = arith.constant dense<0.000000e+00> : vector<2x128xf32>
    %16 = tpu.matmul %14, %15, %cst_14 {dimension_numbers = #tpu.dot_dimension_numbers<[1], [0], [0], [1], [0, 0, 1, 1], [], []>} : vector<2x32xf32>, vector<32x128xf32>, vector<2x128xf32> -> vector<2x128xf32>
    %c0_15 = arith.constant 0 : index
    %c0_16 = arith.constant 0 : index
    %17 = vector.load %arg7[%c0_15, %c0_16] : memref<1x128xf32, #tpu.memory_space<vmem>>, vector<1x128xf32>
    %18 = vector.broadcast %17 : vector<1x128xf32> to vector<2x128xf32>
    %19 = arith.addf %16, %18 : vector<2x128xf32>
    %c0_17 = arith.constant 0 : index
    %c0_18 = arith.constant 0 : index
    %20 = vector.load %arg8[%c0_17, %c0_18] : memref<2x128xf32, #tpu.memory_space<vmem>>, vector<2x128xf32>
    tpu.vector_store %arg8[%c0_17, %c0_18], %19 {strides = array<i32>} : memref<2x128xf32, #tpu.memory_space<vmem>>, vector<2x128xf32>,
    return
  }
  func.func @transform_0(%arg0: i32) -> (i32, i32) {
    %c0_i32 = arith.constant 0 : i32
    %c0_i32_0 = arith.constant 0 : i32
    return %arg0, %c0_i32 : i32, i32
  }
  func.func @transform_1(%arg0: i32) -> (i32, i32) {
    %c0_i32 = arith.constant 0 : i32
    %c0_i32_0 = arith.constant 0 : i32
    %c0_i32_1 = arith.constant 0 : i32
    return %c0_i32, %c0_i32_0 : i32, i32
  }
  func.func @transform_2(%arg0: i32) -> (i32, i32) {
    %c0_i32 = arith.constant 0 : i32
    %c0_i32_0 = arith.constant 0 : i32
    %c0_i32_1 = arith.constant 0 : i32
    return %c0_i32, %c0_i32_0 : i32, i32
  }
  func.func @transform_3(%arg0: i32) -> (i32, i32) {
    %c0_i32 = arith.constant 0 : i32
    %c0_i32_0 = arith.constant 0 : i32
    %c0_i32_1 = arith.constant 0 : i32
    return %c0_i32, %c0_i32_0 : i32, i32
  }
  func.func @transform_4(%arg0: i32) -> (i32, i32) {
    %c0_i32 = arith.constant 0 : i32
    %c0_i32_0 = arith.constant 0 : i32
    %c0_i32_1 = arith.constant 0 : i32
    return %c0_i32, %c0_i32_0 : i32, i32
  }
  func.func @transform_5(%arg0: i32) -> (i32, i32) {
    %c0_i32 = arith.constant 0 : i32
    %c0_i32_0 = arith.constant 0 : i32
    %c0_i32_1 = arith.constant 0 : i32
    return %c0_i32, %c0_i32_0 : i32, i32
  }
  func.func @transform_6(%arg0: i32) -> (i32, i32) {
    %c0_i32 = arith.constant 0 : i32
    %c0_i32_0 = arith.constant 0 : i32
    %c0_i32_1 = arith.constant 0 : i32
    return %c0_i32, %c0_i32_0 : i32, i32
  }
  func.func @transform_7(%arg0: i32) -> (i32, i32) {
    %c0_i32 = arith.constant 0 : i32
    %c0_i32_0 = arith.constant 0 : i32
    return %arg0, %c0_i32 : i32, i32
  }
}

</mosaic_0001>

<bundles_post_ra>
// kernel: convnet_forward.1
= control target key start
LH: loop header
LB: loop body
LE: loop exit
PB: predicated region body
PF: predicated region fallthrough
CT: control target
= control target key end

     0   :  { %v762_v7 = vmov 0.0|0.0   ;;  %v763_v8 = vmov 0.0   ;;  %vm764_vm0 = vmmov 0   ;;  %vm88_vm1 = vcmask 1042432   ;;  %s1092_s0 = inlined_call_operand.vmem [shape: f32[2,99], index: 0, kind: input, shape index: {}]   ;;  %s1093_s1 = inlined_call_operand.vmem [shape: f32[99,288], index: 1, kind: input, shape index: {}]   ;;  %s1094_s2 = inlined_call_operand.vmem [shape: f32[1,288], index: 2, kind: input, shape index: {}]   ;;  %s1095_s3 = inlined_call_operand.vmem [shape: f32[288,32], index: 3, kind: input, shape index: {}]   ;;  %s1096_s4 = inlined_call_operand.vmem [shape: f32[1,32], index: 4, kind: input, shape index: {}]   ;;  %s1097_s5 = inlined_call_operand.vmem [shape: f32[32,128], index: 5, kind: input, shape index: {}]   ;;  %s1098_s6 = inlined_call_operand.vmem [shape: f32[1,128], index: 6, kind: input, shape index: {}]   ;;  %s1099_s7 = inlined_call_operand.hbm [shape: f32[2,128], index: 7, kind: output, shape index: {}]  }
   0x1   :  { %v29_v0 = vld [vmem:[%s1093_s1 + $0x8] sm:$0xff]  ;;  %v32_v1 = vld [vmem:[%s1093_s1 + $0x20] sm:$0xff]  ;;  %v31_v4 = vld [vmem:[%s1093_s1 + $0x18] sm:$0xff]  ;;  %672 = vmatprep.subr.bf16.mxu1 %v762_v7  ;;  %162 = vmatprep.mubr.f32.mxu0 %v763_v8 }
   0x2   :  { %v28_v2 = vld [vmem:[%s1093_s1] sm:$0xff]  ;;  %v648_v3 = vpack.c.bf16 %v32_v1, %v29_v0  ;;  %v35_v5 = vld [vmem:[%s1093_s1 + $0x38] sm:$0xff]  ;;  %v38_v6 = vld [vmem:[%s1093_s1 + $0x50] sm:$0xff]  ;;  %623 = vmatprep.mubr.msk.f32.mxu1 %vm764_vm0, %v763_v8 }
   0x3   :  { %v650_v9 = vpack.c.bf16 %v31_v4, %v28_v2  ;;  %v652_v10 = vpack.c.bf16 %v38_v6, %v35_v5  ;;  %v34_v11 = vld [vmem:[%s1093_s1 + $0x30] sm:$0xff]  ;;  %v37_v12 = vld [vmem:[%s1093_s1 + $0x48] sm:$0xff]  ;;  %v44_v16 = vld [vmem:[%s1093_s1 + $0x80] sm:$0xff] }
   0x4   :  { %v30_v13 = vld [vmem:[%s1093_s1 + $0x10] sm:$0xff]  ;;  %649 = vmatprep.subr.bf16.mxu0 %v648_v3  ;;  %v33_v14 = vld [vmem:[%s1093_s1 + $0x28] sm:$0xff]  ;;  %v654_v17 = vpack.c.bf16 %v37_v12, %v34_v11  ;;  %v36_v19 = vld [vmem:[%s1093_s1 + $0x40] sm:$0xff] }
   0x5   :  { %v41_v15 = vld [vmem:[%s1093_s1 + $0x68] sm:$0xff]  ;;  %651 = vmatpush1.bf16.msra.mxu0 %v650_v9  ;;  %v673_v18 = vpack.c.bf16 %v33_v14, %v30_v13  ;;  %v40_v21 = vld [vmem:[%s1093_s1 + $0x60] sm:$0xff]  ;;  %v43_v22 = vld [vmem:[%s1093_s1 + $0x78] sm:$0xff] }
   0x6   :  { %653 = vmatprep.subr.bf16.mxu0 %v652_v10  ;;  %v656_v20 = vpack.c.bf16 %v44_v16, %v41_v15  ;;  %v39_v23 = vld [vmem:[%s1093_s1 + $0x58] sm:$0xff]  ;;  %v50_v26 = vld [vmem:[%s1093_s1 + $0xb0] sm:$0xff]  ;;  %v45_v28 = vld [vmem:[%s1093_s1 + $0x88] sm:$0xff]  ;;  %v658_v29 = vpack.c.bf16 %v43_v22, %v40_v21 }
   0x7   :  { %674 = vmatpush3.bf16.msra.mxu1 %v673_v18  ;;  %v676_v24 = vpack.c.bf16 %v39_v23, %v36_v19  ;;  %v47_v25 = vld [vmem:[%s1093_s1 + $0x98] sm:$0xff]  ;;  %v42_v27 = vld [vmem:[%s1093_s1 + $0x70] sm:$0xff]  ;;  %v49_v32 = vld [vmem:[%s1093_s1 + $0xa8] sm:$0xff] }
   0x8   :  { %675 = vmatprep.subr.bf16.mxu1 %v762_v7  ;;  %v660_v30 = vpack.c.bf16 %v50_v26, %v47_v25  ;;  %v46_v31 = vld [vmem:[%s1093_s1 + $0x90] sm:$0xff]  ;;  %v679_v33 = vpack.c.bf16 %v45_v28, %v42_v27  ;;  %v53_v34 = vld [vmem:[%s1093_s1 + $0xc8] sm:$0xff]  ;;  %v56_v35 = vld [vmem:[%s1093_s1 + $0xe0] sm:$0xff] }
   0x9   :  { %655 = vmatpush1.bf16.msra.mxu0 %v654_v17  ;;  %v48_v36 = vld [vmem:[%s1093_s1 + $0xa0] sm:$0xff]  ;;  %v51_v37 = vld [vmem:[%s1093_s1 + $0xb8] sm:$0xff]  ;;  %v662_v38 = vpack.c.bf16 %v49_v32, %v46_v31  ;;  %v664_v39 = vpack.c.bf16 %v56_v35, %v53_v34  ;;  %v62_v44 = vld [vmem:[%s1093_s1 + $0x110] sm:$0xff] }
   0xa   :  { %657 = vmatprep.subr.bf16.mxu0 %v656_v20  ;;  %v52_v40 = vld [vmem:[%s1093_s1 + $0xc0] sm:$0xff]  ;;  %v55_v41 = vld [vmem:[%s1093_s1 + $0xd8] sm:$0xff]  ;;  %v682_v42 = vpack.c.bf16 %v51_v37, %v48_v36  ;;  %v54_v45 = vld [vmem:[%s1093_s1 + $0xd0] sm:$0xff] }
   0xb   :  { %677 = vmatpush3.bf16.msra.mxu1 %v676_v24  ;;  %v59_v43 = vld [vmem:[%s1093_s1 + $0xf8] sm:$0xff]  ;;  %v57_v46 = vld [vmem:[%s1093_s1 + $0xe8] sm:$0xff]  ;;  %v666_v47 = vpack.c.bf16 %v55_v41, %v52_v40  ;;  %v58_v49 = vld [vmem:[%s1093_s1 + $0xf0] sm:$0xff] }
   0xc   :  { %678 = vmatprep.subr.bf16.mxu1 %v762_v7  ;;  %v668_v48 = vpack.c.bf16 %v62_v44, %v59_v43  ;;  %v61_v50 = vld [vmem:[%s1093_s1 + $0x108] sm:$0xff]  ;;  %v685_v51 = vpack.c.bf16 %v57_v46, %v54_v45  ;;  %v60_v52 = vld [vmem:[%s1093_s1 + $0x100] sm:$0xff]  ;;  %v63_v53 = vld [vmem:[%s1093_s1 + $0x118] sm:$0xff] }
   0xd   :  { %659 = vmatpush1.bf16.msra.mxu0 %v658_v29  ;;  %v670_v54 = vpack.c.bf16 %v61_v50, %v58_v49  ;;  %v65_v55 = vld [vmem:[%s1093_s1 + $0x128] sm:$0x7]  ;;  %v688_v56 = vpack.c.bf16 %v63_v53, %v60_v52  ;;  %v258_v57 = vld [vmem:[%s1095_s3 + $0x80] sm:$0xff] }
   0xe   :  { %661 = vmatprep.subr.bf16.mxu0 %v660_v30  ;;  %v259_v58 = vld [vmem:[%s1095_s3 + $0x88] sm:$0xff] }
   0xf   :  { %680 = vmatpush3.bf16.msra.mxu1 %v679_v33 }
  0x10   :  { %681 = vmatprep.subr.bf16.mxu1 %v762_v7 }
  0x11   :  { %663 = vmatpush1.bf16.msra.mxu0 %v662_v38 }
  0x12   :  { %665 = vmatprep.subr.bf16.mxu0 %v664_v39 }
  0x13   :  { %683 = vmatpush3.bf16.msra.mxu1 %v682_v42 }
  0x14   :  { %684 = vmatprep.subr.bf16.mxu1 %v762_v7 }
  0x15   :  { %667 = vmatpush1.bf16.msra.mxu0 %v666_v47 }
  0x16   :  { %669 = vmatprep.subr.bf16.mxu0 %v668_v48 }
  0x17   :  { %686 = vmatpush3.bf16.msra.mxu1 %v685_v51 }
  0x18   :  { %12 = vsyncpa [#allocation3], 0  ;;  %687 = vmatprep.subr.bf16.mxu1 %v762_v7  ;;  %v242_v59 = vld [vmem:[%s1095_s3] sm:$0xff]  ;;  %v243_v60 = vld [vmem:[%s1095_s3 + $0x8] sm:$0xff]  ;;  %v690_v0 = vpack.c.bf16 %v259_v58, %v258_v57  ;;  %vm84_vm2 = vcmask 809984   ;;  %v69_v52 = vlaneseq  ;;  %vm285_vm3 = vcmask 261120  }
  0x19   :  { %671 = vmatpush1.bf16.msra.mxu0 %v670_v54  ;;  %v260_v61 = vld [vmem:[%s1095_s3 + $0x90] sm:$0xff]  ;;  %v261_v62 = vld [vmem:[%s1095_s3 + $0x98] sm:$0xff]  ;;  %v64_v63 = vld [vmem:[%s1093_s1 + $0x120] sm:$0x7]  ;;  %v692_v2 = vpack.c.bf16 %v243_v60, %v242_v59 }
  0x1a   :  { %529 = vmatprep.subr.msk.mxu0 %vm88_vm1, %v65_v55  ;;  %v27_v1 = vld [vmem:[%s1092_s0] sm:$0x3]  ;;  %v66_v3 = vld [vmem:[%s1093_s1 + $0x130] sm:$0x7]  ;;  %v694_v4 = vpack.c.bf16 %v261_v62, %v260_v61  ;;  %v245_v6 = vld [vmem:[%s1095_s3 + $0x18] sm:$0xff]  ;;  %v70_v53 = vshrl.u32 %v69_v52, 7 }
  0x1b   :  { %689 = vmatpush3.bf16.msra.mxu1 %v688_v56  ;;  %v244_v5 = vld [vmem:[%s1095_s3 + $0x10] sm:$0xff]  ;;  %v262_v9 = vld [vmem:[%s1095_s3 + $0xa0] sm:$0xff]  ;;  %v263_v10 = vld [vmem:[%s1095_s3 + $0xa8] sm:$0xff] }
  0x1c   :  { %621 = vmatprep.subr.mxu1 %v763_v8  ;;  %v696_v11 = vpack.c.bf16 %v245_v6, %v244_v5  ;;  %v698_v12 = vpack.c.bf16 %v263_v10, %v262_v9  ;;  %v246_v13 = vld [vmem:[%s1095_s3 + $0x20] sm:$0xff]  ;;  %v247_v14 = vld [vmem:[%s1095_s3 + $0x28] sm:$0xff]  ;;  %v264_v15 = vld [vmem:[%s1095_s3 + $0xb0] sm:$0xff]  ;;  %v71_v54 = vsub.s32 0, %v70_v53  ;;  %v75_v56 = vsub.s32 1, %v70_v53 }
  0x1d   :  { %530 = vmatpush1.msk.msra.mxu0 %vm88_vm1, %v64_v63  ;;  %v265_v16 = vld [vmem:[%s1095_s3 + $0xb8] sm:$0xff]  ;;  %v700_v17 = vpack.c.bf16 %v247_v14, %v246_v13  ;;  %v248_v19 = vld [vmem:[%s1095_s3 + $0x30] sm:$0xff]  ;;  %v266_v21 = vld [vmem:[%s1095_s3 + $0xc0] sm:$0xff]  ;;  %v79_v57 = vsub.s32 2, %v70_v53 }
  0x1e   :  { %531 = vmatmul.mubr.msk.f32.vlgmr.msra.gmra.mrb[0].mxu0 %vm84_vm2, %v27_v1  ;;  %691 = vmatprep.subr.bf16.mxu0 %v690_v0  ;;  %v702_v18 = vpack.c.bf16 %v265_v16, %v264_v15  ;;  %v249_v20 = vld [vmem:[%s1095_s3 + $0x38] sm:$0xff]  ;;  %v267_v22 = vld [vmem:[%s1095_s3 + $0xc8] sm:$0xff]  ;;  %v250_v25 = vld [vmem:[%s1095_s3 + $0x40] sm:$0xff] }
  0x1f   :  { %622 = vmatpush3.msk.msra.mxu1 %vm88_vm1, %v66_v3  ;;  %693 = vmatpush3.bf16.msra.mxu0 %v692_v2  ;;  %v704_v23 = vpack.c.bf16 %v249_v20, %v248_v19  ;;  %v706_v24 = vpack.c.bf16 %v267_v22, %v266_v21  ;;  %v251_v26 = vld [vmem:[%s1095_s3 + $0x48] sm:$0xff]  ;;  %v268_v27 = vld [vmem:[%s1095_s3 + $0xd0] sm:$0xff]  ;;  %v269_v28 = vld [vmem:[%s1095_s3 + $0xd8] sm:$0xff] }
  0x20   :  { %624 = vmatmul.mubr.msk.f32.vlgmr.msra.gmra.mrb[0].mxu1 %vm84_vm2, %v27_v1  ;;  %695 = vmatprep.subr.bf16.mxu0 %v694_v4  ;;  %v708_v29 = vpack.c.bf16 %v251_v26, %v250_v25  ;;  %v710_v30 = vpack.c.bf16 %v269_v28, %v268_v27  ;;  %v252_v31 = vld [vmem:[%s1095_s3 + $0x50] sm:$0xff]  ;;  %v253_v32 = vld [vmem:[%s1095_s3 + $0x58] sm:$0xff]  ;;  %v270_v33 = vld [vmem:[%s1095_s3 + $0xe0] sm:$0xff] }
  0x21   :  { %722 = vmatprep.subr.bf16.mxu1 %v762_v7  ;;  %634 = vmatprep.mubr.msk.f32.mxu1 %vm764_vm0, %v763_v8  ;;  %v271_v34 = vld [vmem:[%s1095_s3 + $0xe8] sm:$0xff]  ;;  %v712_v35 = vpack.c.bf16 %v253_v32, %v252_v31  ;;  %v254_v37 = vld [vmem:[%s1095_s3 + $0x60] sm:$0xff]  ;;  %v272_v40 = vld [vmem:[%s1095_s3 + $0xf0] sm:$0xff] }
  0x22   :  { %v714_v36 = vpack.c.bf16 %v271_v34, %v270_v33  ;;  %v255_v38 = vld [vmem:[%s1095_s3 + $0x68] sm:$0xff]  ;;  %v273_v41 = vld [vmem:[%s1095_s3 + $0xf8] sm:$0xff]  ;;  %v256_v43 = vld [vmem:[%s1095_s3 + $0x70] sm:$0xff] }
  0x23   :  { %697 = vmatpush3.bf16.msra.mxu0 %v696_v11  ;;  %v716_v39 = vpack.c.bf16 %v255_v38, %v254_v37  ;;  %v718_v42 = vpack.c.bf16 %v273_v41, %v272_v40  ;;  %v257_v44 = vld [vmem:[%s1095_s3 + $0x78] sm:$0xff]  ;;  %v274_v45 = vld [vmem:[%s1095_s3 + $0x100] sm:$0xff]  ;;  %v275_v47 = vld [vmem:[%s1095_s3 + $0x108] sm:$0xff] }
  0x24   :  { %699 = vmatprep.subr.bf16.mxu0 %v698_v12  ;;  %v720_v46 = vpack.c.bf16 %v257_v44, %v256_v43  ;;  %v723_v48 = vpack.c.bf16 %v275_v47, %v274_v45  ;;  %v276_v49 = vld [vmem:[%s1095_s3 + $0x110] sm:$0xff]  ;;  %v277_v50 = vld [vmem:[%s1095_s3 + $0x118] sm:$0xff]  ;;  %v67_v55 = vld [vmem:[%s1094_s2] sm:$0x7] }
  0x25   :  { %v726_v51 = vpack.c.bf16 %v277_v50, %v276_v49  ;;  %v72_v58 = vrot.slane %v67_v55, %v71_v54  ;;  %v76_v59 = vrot.slane %v67_v55, %v75_v56  ;;  %v80_v60 = vrot.slane %v67_v55, %v79_v57  ;;  %v430_v9 = vld [vmem:[%s1097_s5] sm:$0xff]  ;;  %v431_v10 = vld [vmem:[%s1097_s5 + $0x8] sm:$0xff]  ;;  %v432_v12 = vld [vmem:[%s1097_s5 + $0x10] sm:$0xff] }
  0x26   :  { %724 = vmatpush3.bf16.msra.mxu1 %v723_v48  ;;  %v729_v11 = vpack.c.bf16 %v431_v10, %v430_v9  ;;  %v536_v22 = vld [vmem:[%s1098_s6] ss:$0 sm:$0xff] }
  0x27   :  { %701 = vmatpush3.bf16.msra.mxu0 %v700_v17  ;;  %725 = vmatprep.subr.bf16.mxu1 %v762_v7  ;;  %v534_v17 = vld [vmem:[%s1096_s4] ss:$0 sm:$0xff] }
  0x28   :  { %703 = vmatprep.subr.bf16.mxu0 %v702_v18 }
  0x2a   :  { %727 = vmatpush3.bf16.msra.mxu1 %v726_v51 }
  0x2b   :  { %705 = vmatpush3.bf16.msra.mxu0 %v704_v23  ;;  %728 = vmatprep.subr.bf16.mxu1 %v762_v7 }
  0x2c   :  { %707 = vmatprep.subr.bf16.mxu0 %v706_v24 }
  0x2f   :  { %709 = vmatpush3.bf16.msra.mxu0 %v708_v29 }
  0x30   :  { %711 = vmatprep.subr.bf16.mxu0 %v710_v30 }
  0x33   :  { %713 = vmatpush3.bf16.msra.mxu0 %v712_v35 }
  0x34   :  { %715 = vmatprep.subr.bf16.mxu0 %v714_v36 }
  0x37   :  { %717 = vmatpush3.bf16.msra.mxu0 %v716_v39 }
  0x38   :  { %719 = vmatprep.subr.bf16.mxu0 %v718_v42 }
  0x3b   :  { %721 = vmatpush3.bf16.msra.mxu0 %v720_v46 }
  0xf1   :  { %v164_v61 = vpop.f32.mrb[0].mxu0 }
  0xf2   :  { %v165_v62 = vadd.f32 %v164_v61, %v72_v58  ;;  %v166_v63 = vpop.f32.mrb[1].mxu0 }
  0xf3   :  { %v167_v0 = vadd.f32 %v166_v63, %v76_v59  ;;  %v235_v1 = vpop.f32.mrb[0].mxu1 }
  0xf4   :  { %v236_v2 = vadd.f32 %v235_v1, %v80_v60  ;;  %v625_v3 = vpop.f32.mrb[1].mxu1  ;;  %v239_v5 = vmax.f32 %v165_v62, 0.0 }
  0xf5   :  { %v240_v4 = vmax.f32 %v167_v0, 0.0 }
  0xf6   :  { %v241_v6 = vmax.f32 %v236_v2, 0.0 }
  0xf7   :  { %353 = vmatprep.mubr.f32.mxu0 %v240_v4 }
  0xf8   :  { %354 = vmatmul.mubr.f32.vlgmr.msra.gmra.mrb[2].mxu0 %v239_v5  ;;  %635 = vmatmul.mubr.msk.f32.vlgmr.msra.gmra.mrb[2].mxu1 %vm285_vm3, %v241_v6 }
  0xf9   :  { %645 = vmatprep.mubr.msk.f32.mxu1 %vm764_vm0, %v763_v8  ;;  %730 = vmatpush3.bf16.msra.mxu1 %v729_v11  ;;  %v433_v8 = vld [vmem:[%s1097_s5 + $0x18] sm:$0xff]  ;;  %s765_s5 = smov [#allocation2]  }
  0xfa   :  { %731 = vmatprep.subr.bf16.mxu1 %v762_v7  ;;  %v732_v13 = vpack.c.bf16 %v433_v8, %v432_v12  ;;  %s521_s21 = sshll.u32 %s765_s5, 4  ;;  %s522_s21 = int_to_ptr.vmem [resolvable:$true] %s521_s21 }
  0xfb   :  { %s738_s22 = scalar_lea.vmem %s522_s21, 32  ;;  %p743_p1 = scmp.lt.s32.totalorder %s522_s21, %s522_s21 }
  0xfc   :  { %p739_p0 = scmp.ne.s32.totalorder %s522_s21, %s738_s22  ;;  %p744_p2 = scmp.lt.s32.totalorder %s738_s22, %s738_s22 }
  0xfd   :  { %733 = vmatpush3.bf16.msra.mxu1 %v732_v13 }
  0xfe   :  { %p745_p3 = por %p744_p2, %p743_p1 }
 0x100   :  { %p746_p4 = pnand %p745_p3, %p739_p0 }
 0x1cb   :  { %v584_v14 = vpop.f32.mrb[2].mxu0  ;;  %v425_v15 = vpop.f32.mrb[2].mxu1 }
 0x1cc   :  { %v585_v16 = vpop.f32.mrb[3].mxu0  ;;  %v636_v18 = vpop.f32.mrb[3].mxu1 }
 0x1cd   :  { %v586_v19 = vadd.f32 %v585_v16, %v584_v14 }
 0x1cf   :  { %v356_v7 = vadd.f32 %v586_v19, %v534_v17 }
 0x1d1   :  { %v426_v20 = vadd.f32 %v425_v15, %v356_v7 }
 0x1d3   :  { %v429_v21 = vmax.f32 %v426_v20, 0.0 }
 0x1d5   :  { %646 = vmatmul.mubr.msk.f32.vlgmr.msra.gmra.mrb[4].mxu1 %vm285_vm3, %v429_v21 }
 0x2a8   :  { %v510_v23 = vpop.f32.mrb[4].mxu1 }
 0x2a9   :  { %v511_v24 = vadd.f32 %v536_v22, %v510_v23  ;;  %v647_v25 = vpop.f32.mrb[5].mxu1 }
 0x2ab   :  { %514 = vst [vmem:[#allocation2] sm:$0x3] %v511_v24 }
 0x2ac   :  { %749 = shalt.err (!%p746_p4)
}
 0x2ad   :  { %s750_s24 = scalar_lea.hbm %s1099_s7, 32 }
 0x2ae   :  { %p751_p5 = scmp.ne.s32.totalorder %s1099_s7, %s750_s24  ;;  %p754_p6 = scmp.lt.u32.totalorder %s750_s24, %s1099_s7 }
 0x2b0   :  { %p756_p7 = pnand %p754_p6, %p751_p5 }
 0x2b2   :  { %759 = shalt.err (!%p756_p7)
}
 0x2b3   :  { %524 = dma.vmem_to_hbm [thread:$0]  %s522_s21, 32, %s1099_s7, [#allocation3]  }
 0x2b4   :  { %760 = dma.done.wait [#allocation3], 32  }
 0x2b5   :  { %761 = vsyncadd [#allocation3], 4294967264 }
 0x2b6   :  { %528 = vsyncpa [#allocation3], 1 }

</bundles_post_ra>
